<compile_context>
chip_gen: v5e
topology: v5e:2x2
jax: 0.10.0
libtpu: 0.0.40
codegen_flags: <defaults>
</compile_context>

<pallas_src>
import math
import functools

import jax
import jax.numpy as jnp
from jax import lax
from jax.experimental import pallas as pl
from jax.experimental.pallas import tpu as pltpu


def attention_group_kernel(x_ref, wqkv_ref, bqkv_ref, wo_ref, bo_ref, out_ref,
                           *rest, vis, heads_per_group, head_dim, seq_len):
    """One grid step == (batch element b, head-group g).

    x_ref:    (1, Sp, H)        bf16 hidden states (full padded sequence)
    wqkv_ref: (G, H, 3*gw)      bf16 fused per-group QKV weights (resident;
                                 scale folded into the Q columns)
    bqkv_ref: (G, 1, 3*gw)      f32 fused per-group QKV biases (resident)
    wo_ref:   (G, gw, H)        bf16 per-group output-projection slices (resident)
    bo_ref:   (1, H)            f32 output-projection bias (resident)
    out_ref:  (1, Sp, H)        f32 attention output (same block across groups:
                                 used directly as the accumulator)
    probs_ref (vis only): (1, hpg, Sp, Sp) f32 softmax probabilities
    """
    probs_ref = rest[0] if vis else None
    g = pl.program_id(1)
    gw = heads_per_group * head_dim

    x = x_ref[0]                                     # (Sp, H) bf16

    # Fused Q/K/V projection for all heads of this group: one MXU matmul
    # with a 3*gw-wide output, bf16 inputs, f32 accumulation.
    qkv = jnp.dot(x, wqkv_ref[g], preferred_element_type=jnp.float32)
    qkv = qkv + bqkv_ref[g]                          # (Sp, 3*gw) f32
    q = qkv[:, 0 * gw:1 * gw].astype(jnp.bfloat16)
    k = qkv[:, 1 * gw:2 * gw].astype(jnp.bfloat16)
    v = qkv[:, 2 * gw:3 * gw].astype(jnp.bfloat16)

    sp = x.shape[0]
    ctx_parts = []
    for hi in range(heads_per_group):                # short static unroll
        lo = hi * head_dim
        qh = q[:, lo:lo + head_dim]
        kh = k[:, lo:lo + head_dim]
        vh = v[:, lo:lo + head_dim]

        # scores = (q * scale) @ k^T   (scale already folded into Wq / bq).
        s = lax.dot_general(qh, kh, (((1,), (1,)), ((), ())),
                            preferred_element_type=jnp.float32)   # (Sp, Sp)
        if sp != seq_len:
            # Mask padded key columns (static branch; absent when Sp == S).
            key_idx = lax.broadcasted_iota(jnp.int32, s.shape, 1)
            s = jnp.where(key_idx < seq_len, s, -1e30)

        # Numerically-stable softmax.
        s = s - jnp.max(s, axis=-1, keepdims=True)
        e = jnp.exp(s)
        denom = jnp.sum(e, axis=-1, keepdims=True)
        if vis:
            p = e / denom                      # exact: these probs are returned
            probs_ref[0, hi] = p               # pre-dropout == eval `weights`
        else:
            p = e * pl.reciprocal(denom, approx=True)   # EUP, output-only path

        ctx_parts.append(jnp.dot(p.astype(jnp.bfloat16), vh,
                                 preferred_element_type=jnp.float32))

    ctx = jnp.concatenate(ctx_parts, axis=-1)        # (Sp, gw) f32
    contrib = jnp.dot(ctx.astype(jnp.bfloat16), wo_ref[g],
                      preferred_element_type=jnp.float32)          # (Sp, H)

    # Accumulate directly into the resident output block (no scratch copy).
    @pl.when(g == 0)
    def _():
        out_ref[0] = contrib + bo_ref[...]

    @pl.when(g > 0)
    def _():
        out_ref[0] = out_ref[0] + contrib


def prepare_attention_params(params, num_heads, heads_per_group=None,
                             target_lanes=256):
    """One-time weight re-layout (hoisted out of the per-call wrapper).

    PyTorch Linear stores W as (out, in); the kernel computes x @ W.T, so we
    pre-transpose, fold the 1/sqrt(hd) scale into the query slice, group the
    heads, fuse Q/K/V along the output axis, and cast weights to bf16.
    Use target_lanes=128 on v5e (128-wide MXU), 256 on v6e/v7x.
    """
    H = params["wq"].shape[0]
    hd = H // num_heads
    if heads_per_group is None:
        heads_per_group = 1
        for hpg in range(1, num_heads + 1):
            if num_heads % hpg == 0 and hpg * hd <= target_lanes:
                heads_per_group = hpg
    G = num_heads // heads_per_group
    gw = heads_per_group * hd
    scale = 1.0 / math.sqrt(hd)

    wqT = params["wq"].T * scale        # (H_in, H_out), scale folded into Q
    wkT = params["wk"].T
    wvT = params["wv"].T
    bq = params["bq"] * scale
    bk = params["bk"]
    bv = params["bv"]

    def group_cols(wT):
        # (H, H) -> (G, H, gw): group g owns output columns [g*gw, (g+1)*gw).
        return wT.reshape(H, G, gw).transpose(1, 0, 2)

    wqkv = jnp.concatenate(
        [group_cols(wqT), group_cols(wkT), group_cols(wvT)], axis=-1
    ).astype(jnp.bfloat16)                              # (G, H, 3*gw)

    def group_bias(b):
        return b.reshape(G, 1, gw)

    bqkv = jnp.concatenate(
        [group_bias(bq), group_bias(bk), group_bias(bv)], axis=-1
    ).astype(jnp.float32)                               # (G, 1, 3*gw)

    # out = concat_h(ctx_h) @ Wo.T + bo = sum_g ctx_g @ Wo.T[g*gw:(g+1)*gw, :] + bo
    wo = params["wo"].T.reshape(G, gw, H).astype(jnp.bfloat16)     # (G, gw, H)
    bo = params["bo"].reshape(1, H).astype(jnp.float32)            # (1, H)

    return dict(wqkv=wqkv, bqkv=bqkv, wo=wo, bo=bo,
                num_heads=num_heads, heads_per_group=heads_per_group,
                head_dim=hd, hidden=H)


def attention_forward(x, prep, vis=True):
    """x: (B, S, H) float32. prep: output of prepare_attention_params."""
    B, S, H = x.shape
    num_heads = prep["num_heads"]
    hpg = prep["heads_per_group"]
    hd = prep["head_dim"]
    G = num_heads // hpg
    gw = hpg * hd

    # Pad the sequence axis: lane-dense (multiple of 128) for realistic
    # lengths, sublane-aligned (multiple of 8) for tiny test sequences.
    pad_to = 128 if S >= 64 else 8
    Sp = pl.cdiv(S, pad_to) * pad_to
    if Sp != S:
        x = jnp.pad(x, ((0, 0), (0, Sp - S), (0, 0)))
    xb = x.astype(jnp.bfloat16)

    kernel = functools.partial(attention_group_kernel, vis=vis,
                               heads_per_group=hpg, head_dim=hd, seq_len=S)

    x_spec = pl.BlockSpec((1, Sp, H), lambda b, g: (b, 0, 0))
    # Weights/biases: full-array blocks with constant index maps -> DMA'd to
    # VMEM once per pallas_call and kept resident across all grid steps
    # (~5 MB bf16 at real TransUNet shapes, well within VMEM on all chips).
    wqkv_spec = pl.BlockSpec((G, H, 3 * gw), lambda b, g: (0, 0, 0))
    bqkv_spec = pl.BlockSpec((G, 1, 3 * gw), lambda b, g: (0, 0, 0))
    wo_spec = pl.BlockSpec((G, gw, H), lambda b, g: (0, 0, 0))
    bo_spec = pl.BlockSpec((1, H), lambda b, g: (0, 0))

    out_spec = pl.BlockSpec((1, Sp, H), lambda b, g: (b, 0, 0))
    if vis:
        out_shape = (
            jax.ShapeDtypeStruct((B, Sp, H), jnp.float32),
            jax.ShapeDtypeStruct((B, num_heads, Sp, Sp), jnp.float32),
        )
        out_specs = (
            out_spec,
            pl.BlockSpec((1, hpg, Sp, Sp), lambda b, g: (b, g, 0, 0)),
        )
    else:
        out_shape = jax.ShapeDtypeStruct((B, Sp, H), jnp.float32)
        out_specs = out_spec

    # Advisory cost hint for the XLA scheduler.
    flops = int(B * (8 * Sp * H * H + 4 * Sp * Sp * H))
    bytes_accessed = int(
        xb.size * 2
        + prep["wqkv"].size * 2 + prep["wo"].size * 2
        + prep["bqkv"].size * 4 + prep["bo"].size * 4
        + B * Sp * H * 4
        + (B * num_heads * Sp * Sp * 4 if vis else 0))
    cost = pl.CostEstimate(flops=flops,
                           transcendentals=int(B * num_heads * Sp * Sp),
                           bytes_accessed=bytes_accessed)

    results = pl.pallas_call(
        kernel,
        out_shape=out_shape,
        grid_spec=pltpu.PrefetchScalarGridSpec(
            num_scalar_prefetch=0,
            grid=(B, G),
            in_specs=[x_spec, wqkv_spec, bqkv_spec, wo_spec, bo_spec],
            out_specs=out_specs,
        ),
        compiler_params=pltpu.CompilerParams(
            dimension_semantics=("parallel", "arbitrary")),
        cost_estimate=cost,
    )(xb, prep["wqkv"], prep["bqkv"], prep["wo"], prep["bo"])

    if vis:
        out, probs = results
        probs = probs[:, :, :S, :S]
    else:
        out = results
        probs = None
    return out[:, :S], probs


def attention_reference(x, params, num_heads):
    """Plain-JAX f32 reference mirroring the PyTorch forward (eval mode)."""
    B, S, H = x.shape
    hd = H // num_heads

    def lin(x, w, b):
        return jnp.einsum("bsh,oh->bso", x, w) + b

    q = lin(x, params["wq"], params["bq"])
    k = lin(x, params["wk"], params["bk"])
    v = lin(x, params["wv"], params["bv"])

    def split(t):  # (B,S,H) -> (B,nh,S,hd)
        return t.reshape(B, S, num_heads, hd).transpose(0, 2, 1, 3)

    q, k, v = split(q), split(k), split(v)
    scores = jnp.einsum("bhqd,bhkd->bhqk", q, k) / math.sqrt(hd)
    probs = jax.nn.softmax(scores, axis=-1)
    ctx = jnp.einsum("bhqk,bhkd->bhqd", probs, v)
    ctx = ctx.transpose(0, 2, 1, 3).reshape(B, S, H)
    out = jnp.einsum("bsh,oh->bso", ctx, params["wo"]) + params["bo"]
    return out, probs


if __name__ == "__main__":
    # Small config consistent with the module: hidden=32, num_heads=4, seq=8.
    B, S, H = 2, 8, 32
    NUM_HEADS = 4

    key = jax.random.PRNGKey(0)
    ks = jax.random.split(key, 9)
    scale = 0.05
    params = {
        "wq": scale * jax.random.normal(ks[0], (H, H), jnp.float32),
        "bq": scale * jax.random.normal(ks[1], (H,), jnp.float32),
        "wk": scale * jax.random.normal(ks[2], (H, H), jnp.float32),
        "bk": scale * jax.random.normal(ks[3], (H,), jnp.float32),
        "wv": scale * jax.random.normal(ks[4], (H, H), jnp.float32),
        "bv": scale * jax.random.normal(ks[5], (H,), jnp.float32),
        "wo": scale * jax.random.normal(ks[6], (H, H), jnp.float32),
        "bo": scale * jax.random.normal(ks[7], (H,), jnp.float32),
    }
    x = jax.random.normal(ks[8], (B, S, H), jnp.float32)

    # One-time weight packing (hoisted out of the forward call).
    prep = prepare_attention_params(params, NUM_HEADS)

    ref_out, ref_probs = attention_reference(x, params, NUM_HEADS)

    # vis=True path (returns attention probabilities like the PyTorch module).
    out, probs = attention_forward(x, prep, vis=True)
    out = jax.block_until_ready(out)
    probs = jax.block_until_ready(probs)
    assert out.shape == (B, S, H)
    assert probs.shape == (B, NUM_HEADS, S, S)
    # bf16 MXU inputs -> loosened tolerance vs the f32 reference.
    assert jnp.allclose(out, ref_out, atol=2e-2, rtol=2e-2)
    assert jnp.allclose(probs, ref_probs, atol=2e-2, rtol=2e-2)

    # vis=False fast path: no (B, nh, S, S) probs materialization / writeback.
    out_nv, probs_nv = attention_forward(x, prep, vis=False)
    out_nv = jax.block_until_ready(out_nv)
    assert probs_nv is None
    assert jnp.allclose(out_nv, ref_out, atol=2e-2, rtol=2e-2)

    print("KERNEL_OK")
</pallas_src>

<mosaic_0001>
module attributes {stable_mosaic.version = 11 : i64} {
  func.func @attention_group_kernel(%arg0: i32, %arg1: i32, %arg2: memref<1x8x32xbf16, #tpu.memory_space<vmem>>, %arg3: memref<1x32x96xbf16, #tpu.memory_space<vmem>>, %arg4: memref<1x1x96xf32, #tpu.memory_space<vmem>>, %arg5: memref<1x32x32xbf16, #tpu.memory_space<vmem>>, %arg6: memref<1x32xf32, #tpu.memory_space<vmem>>, %arg7: memref<1x8x32xf32, #tpu.memory_space<vmem>>, %arg8: memref<1x4x8x8xf32, #tpu.memory_space<vmem>>) attributes {dimension_semantics = [#tpu.dimension_semantics<parallel>, #tpu.dimension_semantics<arbitrary>], iteration_bounds = array<i64: 2, 1>, scalar_prefetch = 0 : i64, scratch_operands = 0 : i64, tpu.core_type = #tpu.core_type<tc>, window_params = [{transform_indices = @transform_0, window_bounds = array<i64: 1, 8, 32>}, {pipeline_mode = #tpu.pipeline_mode<synchronous>, transform_indices = @transform_1, window_bounds = array<i64: 1, 32, 96>}, {pipeline_mode = #tpu.pipeline_mode<synchronous>, transform_indices = @transform_2, window_bounds = array<i64: 1, 1, 96>}, {pipeline_mode = #tpu.pipeline_mode<synchronous>, transform_indices = @transform_3, window_bounds = array<i64: 1, 32, 32>}, {pipeline_mode = #tpu.pipeline_mode<synchronous>, transform_indices = @transform_4, window_bounds = array<i64: 1, 32>}, {transform_indices = @transform_5, window_bounds = array<i64: 1, 8, 32>}, {transform_indices = @transform_6, window_bounds = array<i64: 1, 4, 8, 8>}]} {
    %c0 = arith.constant 0 : index
    %c0_0 = arith.constant 0 : index
    %c0_1 = arith.constant 0 : index
    %0 = vector.load %arg2[%c0, %c0_0, %c0_1] : memref<1x8x32xbf16, #tpu.memory_space<vmem>>, vector<1x8x32xbf16>
    %1 = vector.shape_cast %0 : vector<1x8x32xbf16> to vector<8x32xbf16>
    %2 = arith.index_cast %arg1 : i32 to index
    %c0_2 = arith.constant 0 : index
    %c0_3 = arith.constant 0 : index
    %3 = vector.load %arg3[%2, %c0_2, %c0_3] : memref<1x32x96xbf16, #tpu.memory_space<vmem>>, vector<1x32x96xbf16>
    %4 = vector.shape_cast %3 : vector<1x32x96xbf16> to vector<32x96xbf16>
    %cst = arith.constant dense<0.000000e+00> : vector<8x96xf32>
    %5 = tpu.matmul %1, %4, %cst {dimension_numbers = #tpu.dot_dimension_numbers<[1], [0], [0], [1], [0, 0, 1, 1], [], []>} : vector<8x32xbf16>, vector<32x96xbf16>, vector<8x96xf32> -> vector<8x96xf32>
    %6 = arith.index_cast %arg1 : i32 to index
    %c0_4 = arith.constant 0 : index
    %c0_5 = arith.constant 0 : index
    %7 = vector.load %arg4[%6, %c0_4, %c0_5] : memref<1x1x96xf32, #tpu.memory_space<vmem>>, vector<1x1x96xf32>
    %8 = vector.shape_cast %7 : vector<1x1x96xf32> to vector<1x96xf32>
    %9 = vector.broadcast %8 : vector<1x96xf32> to vector<8x96xf32>
    %10 = arith.addf %5, %9 : vector<8x96xf32>
    %11 = vector.extract_strided_slice %10 {offsets = [0, 0], sizes = [8, 32], strides = [1, 1]} : vector<8x96xf32> to vector<8x32xf32>
    %12 = arith.truncf %11 : vector<8x32xf32> to vector<8x32xbf16>
    %13 = vector.extract_strided_slice %10 {offsets = [0, 32], sizes = [8, 32], strides = [1, 1]} : vector<8x96xf32> to vector<8x32xf32>
    %14 = arith.truncf %13 : vector<8x32xf32> to vector<8x32xbf16>
    %15 = vector.extract_strided_slice %10 {offsets = [0, 64], sizes = [8, 32], strides = [1, 1]} : vector<8x96xf32> to vector<8x32xf32>
    %16 = arith.truncf %15 : vector<8x32xf32> to vector<8x32xbf16>
    %17 = vector.extract_strided_slice %12 {offsets = [0, 0], sizes = [8, 8], strides = [1, 1]} : vector<8x32xbf16> to vector<8x8xbf16>
    %18 = vector.extract_strided_slice %14 {offsets = [0, 0], sizes = [8, 8], strides = [1, 1]} : vector<8x32xbf16> to vector<8x8xbf16>
    %19 = vector.extract_strided_slice %16 {offsets = [0, 0], sizes = [8, 8], strides = [1, 1]} : vector<8x32xbf16> to vector<8x8xbf16>
    %cst_6 = arith.constant dense<0.000000e+00> : vector<8x8xf32>
    %20 = tpu.matmul %17, %18, %cst_6 {dimension_numbers = #tpu.dot_dimension_numbers<[1], [1], [0], [0], [0, 0, 1, 0], [], []>} : vector<8x8xbf16>, vector<8x8xbf16>, vector<8x8xf32> -> vector<8x8xf32>
    %cst_7 = arith.constant dense<0xFF800000> : vector<8xf32>
    %21 = vector.multi_reduction <maximumf>, %20, %cst_7 [1] : vector<8x8xf32> to vector<8xf32>
    %22 = vector.shape_cast %21 : vector<8xf32> to vector<8x1xf32>
    %23 = vector.broadcast %22 : vector<8x1xf32> to vector<8x8xf32>
    %24 = arith.subf %20, %23 : vector<8x8xf32>
    %25 = math.exp %24 : vector<8x8xf32>
    %cst_8 = arith.constant dense<0.000000e+00> : vector<8xf32>
    %26 = vector.multi_reduction <add>, %25, %cst_8 [1] : vector<8x8xf32> to vector<8xf32>
    %27 = vector.shape_cast %26 : vector<8xf32> to vector<8x1xf32>
    %28 = vector.broadcast %27 : vector<8x1xf32> to vector<8x8xf32>
    %29 = arith.divf %25, %28 : vector<8x8xf32>
    %c0_9 = arith.constant 0 : index
    %c0_10 = arith.constant 0 : index
    %c0_11 = arith.constant 0 : index
    %c0_12 = arith.constant 0 : index
    %30 = vector.load %arg8[%c0_9, %c0_10, %c0_11, %c0_12] : memref<1x4x8x8xf32, #tpu.memory_space<vmem>>, vector<1x1x8x8xf32>
    %31 = vector.shape_cast %30 : vector<1x1x8x8xf32> to vector<8x8xf32>
    %32 = vector.shape_cast %29 : vector<8x8xf32> to vector<1x1x8x8xf32>
    tpu.vector_store %arg8[%c0_9, %c0_10, %c0_11, %c0_12], %32 {strides = array<i32>} : memref<1x4x8x8xf32, #tpu.memory_space<vmem>>, vector<1x1x8x8xf32>,
    %33 = arith.truncf %29 : vector<8x8xf32> to vector<8x8xbf16>
    %cst_13 = arith.constant dense<0.000000e+00> : vector<8x8xf32>
    %34 = tpu.matmul %33, %19, %cst_13 {dimension_numbers = #tpu.dot_dimension_numbers<[1], [0], [0], [1], [0, 0, 1, 1], [], []>} : vector<8x8xbf16>, vector<8x8xbf16>, vector<8x8xf32> -> vector<8x8xf32>
    %35 = vector.extract_strided_slice %12 {offsets = [0, 8], sizes = [8, 8], strides = [1, 1]} : vector<8x32xbf16> to vector<8x8xbf16>
    %36 = vector.extract_strided_slice %14 {offsets = [0, 8], sizes = [8, 8], strides = [1, 1]} : vector<8x32xbf16> to vector<8x8xbf16>
    %37 = vector.extract_strided_slice %16 {offsets = [0, 8], sizes = [8, 8], strides = [1, 1]} : vector<8x32xbf16> to vector<8x8xbf16>
    %cst_14 = arith.constant dense<0.000000e+00> : vector<8x8xf32>
    %38 = tpu.matmul %35, %36, %cst_14 {dimension_numbers = #tpu.dot_dimension_numbers<[1], [1], [0], [0], [0, 0, 1, 0], [], []>} : vector<8x8xbf16>, vector<8x8xbf16>, vector<8x8xf32> -> vector<8x8xf32>
    %cst_15 = arith.constant dense<0xFF800000> : vector<8xf32>
    %39 = vector.multi_reduction <maximumf>, %38, %cst_15 [1] : vector<8x8xf32> to vector<8xf32>
    %40 = vector.shape_cast %39 : vector<8xf32> to vector<8x1xf32>
    %41 = vector.broadcast %40 : vector<8x1xf32> to vector<8x8xf32>
    %42 = arith.subf %38, %41 : vector<8x8xf32>
    %43 = math.exp %42 : vector<8x8xf32>
    %cst_16 = arith.constant dense<0.000000e+00> : vector<8xf32>
    %44 = vector.multi_reduction <add>, %43, %cst_16 [1] : vector<8x8xf32> to vector<8xf32>
    %45 = vector.shape_cast %44 : vector<8xf32> to vector<8x1xf32>
    %46 = vector.broadcast %45 : vector<8x1xf32> to vector<8x8xf32>
    %47 = arith.divf %43, %46 : vector<8x8xf32>
    %c0_17 = arith.constant 0 : index
    %c1 = arith.constant 1 : index
    %c0_18 = arith.constant 0 : index
    %c0_19 = arith.constant 0 : index
    %48 = vector.load %arg8[%c0_17, %c1, %c0_18, %c0_19] : memref<1x4x8x8xf32, #tpu.memory_space<vmem>>, vector<1x1x8x8xf32>
    %49 = vector.shape_cast %48 : vector<1x1x8x8xf32> to vector<8x8xf32>
    %50 = vector.shape_cast %47 : vector<8x8xf32> to vector<1x1x8x8xf32>
    tpu.vector_store %arg8[%c0_17, %c1, %c0_18, %c0_19], %50 {strides = array<i32>} : memref<1x4x8x8xf32, #tpu.memory_space<vmem>>, vector<1x1x8x8xf32>,
    %51 = arith.truncf %47 : vector<8x8xf32> to vector<8x8xbf16>
    %cst_20 = arith.constant dense<0.000000e+00> : vector<8x8xf32>
    %52 = tpu.matmul %51, %37, %cst_20 {dimension_numbers = #tpu.dot_dimension_numbers<[1], [0], [0], [1], [0, 0, 1, 1], [], []>} : vector<8x8xbf16>, vector<8x8xbf16>, vector<8x8xf32> -> vector<8x8xf32>
    %53 = vector.extract_strided_slice %12 {offsets = [0, 16], sizes = [8, 8], strides = [1, 1]} : vector<8x32xbf16> to vector<8x8xbf16>
    %54 = vector.extract_strided_slice %14 {offsets = [0, 16], sizes = [8, 8], strides = [1, 1]} : vector<8x32xbf16> to vector<8x8xbf16>
    %55 = vector.extract_strided_slice %16 {offsets = [0, 16], sizes = [8, 8], strides = [1, 1]} : vector<8x32xbf16> to vector<8x8xbf16>
    %cst_21 = arith.constant dense<0.000000e+00> : vector<8x8xf32>
    %56 = tpu.matmul %53, %54, %cst_21 {dimension_numbers = #tpu.dot_dimension_numbers<[1], [1], [0], [0], [0, 0, 1, 0], [], []>} : vector<8x8xbf16>, vector<8x8xbf16>, vector<8x8xf32> -> vector<8x8xf32>
    %cst_22 = arith.constant dense<0xFF800000> : vector<8xf32>
    %57 = vector.multi_reduction <maximumf>, %56, %cst_22 [1] : vector<8x8xf32> to vector<8xf32>
    %58 = vector.shape_cast %57 : vector<8xf32> to vector<8x1xf32>
    %59 = vector.broadcast %58 : vector<8x1xf32> to vector<8x8xf32>
    %60 = arith.subf %56, %59 : vector<8x8xf32>
    %61 = math.exp %60 : vector<8x8xf32>
    %cst_23 = arith.constant dense<0.000000e+00> : vector<8xf32>
    %62 = vector.multi_reduction <add>, %61, %cst_23 [1] : vector<8x8xf32> to vector<8xf32>
    %63 = vector.shape_cast %62 : vector<8xf32> to vector<8x1xf32>
    %64 = vector.broadcast %63 : vector<8x1xf32> to vector<8x8xf32>
    %65 = arith.divf %61, %64 : vector<8x8xf32>
    %c0_24 = arith.constant 0 : index
    %c2 = arith.constant 2 : index
    %c0_25 = arith.constant 0 : index
    %c0_26 = arith.constant 0 : index
    %66 = vector.load %arg8[%c0_24, %c2, %c0_25, %c0_26] : memref<1x4x8x8xf32, #tpu.memory_space<vmem>>, vector<1x1x8x8xf32>
    %67 = vector.shape_cast %66 : vector<1x1x8x8xf32> to vector<8x8xf32>
    %68 = vector.shape_cast %65 : vector<8x8xf32> to vector<1x1x8x8xf32>
    tpu.vector_store %arg8[%c0_24, %c2, %c0_25, %c0_26], %68 {strides = array<i32>} : memref<1x4x8x8xf32, #tpu.memory_space<vmem>>, vector<1x1x8x8xf32>,
    %69 = arith.truncf %65 : vector<8x8xf32> to vector<8x8xbf16>
    %cst_27 = arith.constant dense<0.000000e+00> : vector<8x8xf32>
    %70 = tpu.matmul %69, %55, %cst_27 {dimension_numbers = #tpu.dot_dimension_numbers<[1], [0], [0], [1], [0, 0, 1, 1], [], []>} : vector<8x8xbf16>, vector<8x8xbf16>, vector<8x8xf32> -> vector<8x8xf32>
    %71 = vector.extract_strided_slice %12 {offsets = [0, 24], sizes = [8, 8], strides = [1, 1]} : vector<8x32xbf16> to vector<8x8xbf16>
    %72 = vector.extract_strided_slice %14 {offsets = [0, 24], sizes = [8, 8], strides = [1, 1]} : vector<8x32xbf16> to vector<8x8xbf16>
    %73 = vector.extract_strided_slice %16 {offsets = [0, 24], sizes = [8, 8], strides = [1, 1]} : vector<8x32xbf16> to vector<8x8xbf16>
    %cst_28 = arith.constant dense<0.000000e+00> : vector<8x8xf32>
    %74 = tpu.matmul %71, %72, %cst_28 {dimension_numbers = #tpu.dot_dimension_numbers<[1], [1], [0], [0], [0, 0, 1, 0], [], []>} : vector<8x8xbf16>, vector<8x8xbf16>, vector<8x8xf32> -> vector<8x8xf32>
    %cst_29 = arith.constant dense<0xFF800000> : vector<8xf32>
    %75 = vector.multi_reduction <maximumf>, %74, %cst_29 [1] : vector<8x8xf32> to vector<8xf32>
    %76 = vector.shape_cast %75 : vector<8xf32> to vector<8x1xf32>
    %77 = vector.broadcast %76 : vector<8x1xf32> to vector<8x8xf32>
    %78 = arith.subf %74, %77 : vector<8x8xf32>
    %79 = math.exp %78 : vector<8x8xf32>
    %cst_30 = arith.constant dense<0.000000e+00> : vector<8xf32>
    %80 = vector.multi_reduction <add>, %79, %cst_30 [1] : vector<8x8xf32> to vector<8xf32>
    %81 = vector.shape_cast %80 : vector<8xf32> to vector<8x1xf32>
    %82 = vector.broadcast %81 : vector<8x1xf32> to vector<8x8xf32>
    %83 = arith.divf %79, %82 : vector<8x8xf32>
    %c0_31 = arith.constant 0 : index
    %c3 = arith.constant 3 : index
    %c0_32 = arith.constant 0 : index
    %c0_33 = arith.constant 0 : index
    %84 = vector.load %arg8[%c0_31, %c3, %c0_32, %c0_33] : memref<1x4x8x8xf32, #tpu.memory_space<vmem>>, vector<1x1x8x8xf32>
    %85 = vector.shape_cast %84 : vector<1x1x8x8xf32> to vector<8x8xf32>
    %86 = vector.shape_cast %83 : vector<8x8xf32> to vector<1x1x8x8xf32>
    tpu.vector_store %arg8[%c0_31, %c3, %c0_32, %c0_33], %86 {strides = array<i32>} : memref<1x4x8x8xf32, #tpu.memory_space<vmem>>, vector<1x1x8x8xf32>,
    %87 = arith.truncf %83 : vector<8x8xf32> to vector<8x8xbf16>
    %cst_34 = arith.constant dense<0.000000e+00> : vector<8x8xf32>
    %88 = tpu.matmul %87, %73, %cst_34 {dimension_numbers = #tpu.dot_dimension_numbers<[1], [0], [0], [1], [0, 0, 1, 1], [], []>} : vector<8x8xbf16>, vector<8x8xbf16>, vector<8x8xf32> -> vector<8x8xf32>
    %89 = tpu.concatenate %34, %52, %70, %88 in 1 : vector<8x8xf32>, vector<8x8xf32>, vector<8x8xf32>, vector<8x8xf32> -> vector<8x32xf32>
    %90 = arith.truncf %89 : vector<8x32xf32> to vector<8x32xbf16>
    %91 = arith.index_cast %arg1 : i32 to index
    %c0_35 = arith.constant 0 : index
    %c0_36 = arith.constant 0 : index
    %92 = vector.load %arg5[%91, %c0_35, %c0_36] : memref<1x32x32xbf16, #tpu.memory_space<vmem>>, vector<1x32x32xbf16>
    %93 = vector.shape_cast %92 : vector<1x32x32xbf16> to vector<32x32xbf16>
    %cst_37 = arith.constant dense<0.000000e+00> : vector<8x32xf32>
    %94 = tpu.matmul %90, %93, %cst_37 {dimension_numbers = #tpu.dot_dimension_numbers<[1], [0], [0], [1], [0, 0, 1, 1], [], []>} : vector<8x32xbf16>, vector<32x32xbf16>, vector<8x32xf32> -> vector<8x32xf32>
    %c0_i32 = arith.constant 0 : i32
    %95 = arith.cmpi eq, %arg1, %c0_i32 : i32
    %96 = arith.extui %95 : i1 to i32
    %c0_i32_38 = arith.constant 0 : i32
    %97 = arith.cmpi ne, %96, %c0_i32_38 : i32
    scf.if %97 {
      %c0_41 = arith.constant 0 : index
      %c0_42 = arith.constant 0 : index
      %101 = vector.load %arg6[%c0_41, %c0_42] : memref<1x32xf32, #tpu.memory_space<vmem>>, vector<1x32xf32>
      %102 = vector.broadcast %101 : vector<1x32xf32> to vector<8x32xf32>
      %103 = arith.addf %94, %102 : vector<8x32xf32>
      %c0_43 = arith.constant 0 : index
      %c0_44 = arith.constant 0 : index
      %c0_45 = arith.constant 0 : index
      %104 = vector.load %arg7[%c0_43, %c0_44, %c0_45] : memref<1x8x32xf32, #tpu.memory_space<vmem>>, vector<1x8x32xf32>
      %105 = vector.shape_cast %104 : vector<1x8x32xf32> to vector<8x32xf32>
      %106 = vector.shape_cast %103 : vector<8x32xf32> to vector<1x8x32xf32>
      tpu.vector_store %arg7[%c0_43, %c0_44, %c0_45], %106 {strides = array<i32>} : memref<1x8x32xf32, #tpu.memory_space<vmem>>, vector<1x8x32xf32>,
    } else {
    }
    %c0_i32_39 = arith.constant 0 : i32
    %98 = arith.cmpi sgt, %arg1, %c0_i32_39 : i32
    %99 = arith.extui %98 : i1 to i32
    %c0_i32_40 = arith.constant 0 : i32
    %100 = arith.cmpi ne, %99, %c0_i32_40 : i32
    scf.if %100 {
      %c0_41 = arith.constant 0 : index
      %c0_42 = arith.constant 0 : index
      %c0_43 = arith.constant 0 : index
      %101 = vector.load %arg7[%c0_41, %c0_42, %c0_43] : memref<1x8x32xf32, #tpu.memory_space<vmem>>, vector<1x8x32xf32>
      %102 = vector.shape_cast %101 : vector<1x8x32xf32> to vector<8x32xf32>
      %103 = arith.addf %102, %94 : vector<8x32xf32>
      %c0_44 = arith.constant 0 : index
      %c0_45 = arith.constant 0 : index
      %c0_46 = arith.constant 0 : index
      %104 = vector.load %arg7[%c0_44, %c0_45, %c0_46] : memref<1x8x32xf32, #tpu.memory_space<vmem>>, vector<1x8x32xf32>
      %105 = vector.shape_cast %104 : vector<1x8x32xf32> to vector<8x32xf32>
      %106 = vector.shape_cast %103 : vector<8x32xf32> to vector<1x8x32xf32>
      tpu.vector_store %arg7[%c0_44, %c0_45, %c0_46], %106 {strides = array<i32>} : memref<1x8x32xf32, #tpu.memory_space<vmem>>, vector<1x8x32xf32>,
    } else {
    }
    return
  }
  func.func @transform_0(%arg0: i32, %arg1: i32) -> (i32, i32, i32) {
    %c0_i32 = arith.constant 0 : i32
    %c0_i32_0 = arith.constant 0 : i32
    %c0_i32_1 = arith.constant 0 : i32
    return %arg0, %c0_i32, %c0_i32_0 : i32, i32, i32
  }
  func.func @transform_1(%arg0: i32, %arg1: i32) -> (i32, i32, i32) {
    %c0_i32 = arith.constant 0 : i32
    %c0_i32_0 = arith.constant 0 : i32
    %c0_i32_1 = arith.constant 0 : i32
    %c0_i32_2 = arith.constant 0 : i32
    return %c0_i32, %c0_i32_0, %c0_i32_1 : i32, i32, i32
  }
  func.func @transform_2(%arg0: i32, %arg1: i32) -> (i32, i32, i32) {
    %c0_i32 = arith.constant 0 : i32
    %c0_i32_0 = arith.constant 0 : i32
    %c0_i32_1 = arith.constant 0 : i32
    %c0_i32_2 = arith.constant 0 : i32
    return %c0_i32, %c0_i32_0, %c0_i32_1 : i32, i32, i32
  }
  func.func @transform_3(%arg0: i32, %arg1: i32) -> (i32, i32, i32) {
    %c0_i32 = arith.constant 0 : i32
    %c0_i32_0 = arith.constant 0 : i32
    %c0_i32_1 = arith.constant 0 : i32
    %c0_i32_2 = arith.constant 0 : i32
    return %c0_i32, %c0_i32_0, %c0_i32_1 : i32, i32, i32
  }
  func.func @transform_4(%arg0: i32, %arg1: i32) -> (i32, i32) {
    %c0_i32 = arith.constant 0 : i32
    %c0_i32_0 = arith.constant 0 : i32
    %c0_i32_1 = arith.constant 0 : i32
    return %c0_i32, %c0_i32_0 : i32, i32
  }
  func.func @transform_5(%arg0: i32, %arg1: i32) -> (i32, i32, i32) {
    %c0_i32 = arith.constant 0 : i32
    %c0_i32_0 = arith.constant 0 : i32
    %c0_i32_1 = arith.constant 0 : i32
    return %arg0, %c0_i32, %c0_i32_0 : i32, i32, i32
  }
  func.func @transform_6(%arg0: i32, %arg1: i32) -> (i32, i32, i32, i32) {
    %c0_i32 = arith.constant 0 : i32
    %c0_i32_0 = arith.constant 0 : i32
    %c0_i32_1 = arith.constant 0 : i32
    return %arg0, %arg1, %c0_i32, %c0_i32_0 : i32, i32, i32, i32
  }
}

</mosaic_0001>

<bundles_post_ra>
// kernel: tpu_custom_call.1
= control target key start
LH: loop header
LB: loop body
LE: loop exit
PB: predicated region body
PF: predicated region fallthrough
CT: control target
= control target key end

     0   :  { %s1580_s0 = inlined_call_operand.hbm [shape: bf16[2,8,32], index: 0, kind: input, shape index: {}]   ;;  %s1581_s1 = inlined_call_operand.hbm [shape: bf16[1,32,96], index: 1, kind: input, shape index: {}]   ;;  %s1582_s2 = inlined_call_operand.vmem [shape: f32[1,1,96], index: 2, kind: input, shape index: {}]   ;;  %s1583_s3 = inlined_call_operand.hbm [shape: bf16[1,32,32], index: 3, kind: input, shape index: {}]   ;;  %s1584_s4 = inlined_call_operand.vmem [shape: f32[1,32], index: 4, kind: input, shape index: {}]   ;;  %s1585_s5 = inlined_call_operand.hbm [shape: f32[2,8,32], index: 5, kind: output, shape index: {0}]   ;;  %s1586_s6 = inlined_call_operand.hbm [shape: f32[2,4,8,8], index: 6, kind: output, shape index: {1}]  }
   0x1   :  { %1588 = sst [smem:[#allocation15_spill]] %s1580_s0 }
   0x2   :  { %1589 = sst [smem:[#allocation16_spill]] %s1581_s1 }
   0x3   :  { %12 = vsyncpa [#allocation3], 0 }
   0x4   :  { %14 = vsyncpa [#allocation3 + $0x1], 0 }
   0x5   :  { %15 = vsyncpa [#allocation6], 0 }
   0x6   :  { %16 = vsyncpa [#allocation4], 0 }
   0x7   :  { %18 = vsyncpa [#allocation4 + $0x1], 0 }
   0x8   :  { %19 = vsyncpa [#allocation10], 0 }
   0x9   :  { %21 = vsyncpa [#allocation10 + $0x1], 0  ;;  %s1347_s21 = smov 0   ;;  %s1349_s22 = smov 0  }
   0xa   :  { %s1351_s23 = smov 0   ;;  %s1353_s24 = smov 0  }
   0xb   :  { %s1355_s25 = smov 0   ;;  %s1357_s26 = smov 0  }
   0xc LB: > { %s905_s27 = sadd.s32 4294967295, %s1291_s26   ;;  %p907_p0 = scmp.ge.s32.totalorder %s1291_s26, 1  ;;  %s1291_s26 = sphi %s1357_s26, %s27_s26   ;;  %s1287_s25 = sphi %s1355_s25, %s1602_s25   ;;  %s1283_s24 = sphi %s1353_s24, %s1601_s24   ;;  %s1279_s23 = sphi %s1351_s23, %s1600_s23   ;;  %s1275_s22 = sphi %s1349_s22, %s1599_s22   ;;  %s1271_s21 = sphi %s1347_s21, %s1598_s21  }
   0xd   : > { %p1381_p1 = scmp.eq.s32.totalorder %s905_s27, 0  ;;  %p208_p2 = scmp.lt.s32.totalorder %s1291_s26, 3 }
   0xe   : > { %s1591_s1 = sld [smem:[#allocation16_spill]]  ;;  %s1293_s9 = smov [#allocation5]  }
   0xf   : > { %p1389_p3 = pnand %p907_p0, %p208_p2  ;;  %s221_s10 = sshll.u32 %s1293_s9, 4  ;;  %s222_s10 = int_to_ptr.vmem [resolvable:$true] %s221_s10 }
  0x10   : > { %p910_p6 = scmp.ge.s32.totalorder %s1291_s26, 2  ;;  %s236_s13 = sshll.u32 %s1583_s3, 4  ;;  %s237_s13 = int_to_ptr.hbm [resolvable:$true] %s236_s13 }
  0x11   : > { %p974_p4 = pneg %p1389_p3  ;;  %s1294_s14 = smov 64  }
  0x12   : > { %s1295_s15 = smov 4   ;;  %s1296_s16 = smov [#allocation7]  }
  0x13   : > { %p975_p5 = pnand %p974_p4, %p1381_p1  ;;  %s238_s17 = sshll.u32 %s1296_s16, 4  ;;  %s239_s17 = int_to_ptr.vmem [resolvable:$true] %s238_s17 }
  0x14   : > { %s219_s7 = sshll.u32 %s1591_s1, 4  ;;  %s39_s18 = sadd.s32 1, %s1287_s25  ;;  %s220_s7 = int_to_ptr.hbm [resolvable:$true] %s219_s7 }
  0x15   : > { %977 = dma.hbm_to_vmem [thread:$0]  (!%p975_p5), %s220_s7, 256, %s222_s10, [#allocation6], %s1294_s14, %s1294_s14, %s1295_s15  }
  0x16   : > { %980 = dma.hbm_to_vmem [thread:$0]  (!%p975_p5), %s237_s13, 256, %s239_s17, [#allocation6], %s1294_s14, %s1294_s14, %s1295_s15  }
  0x17   : > { %s906_s19 = sadd.s32 4294967294, %s1291_s26   ;;  %p41_p7 = scmp.ge.s32.totalorder %s39_s18, 2 }
  0x18   : > { %s46_s20 = sadd.s32 1, %s1279_s23  ;;  %p53_p8 = scmp.ne.s32.totalorder %s1279_s23, %s1275_s22 }
  0x19   : > { %s1604_s18 = smov (%p41_p7, %s39_s18), 0  ;;  %p54_p9 = scmp.eq.s32.totalorder %s1291_s26, 0 }
  0x1a   : > { %p59_p10 = scmp.ne.s32.totalorder %s1275_s22, %s1271_s21  ;;  %s43_s29 = ssub.s32 %s1287_s25, %s1604_s18 }
  0x1b   : > { %p167_p11 = scmp.eq.s32.totalorder %s905_s27, 1  ;;  %p44_p12 = scmp.eq.s32.totalorder %s43_s29, 0 }
  0x1c   : > { %p1417_p13 = por %p1381_p1, %p59_p10  ;;  %p173_p2 = scmp.eq.s32.totalorder %s906_s19, 1 }
  0x1d   : > { %p1421_p0 = por %p167_p11, %p53_p8  ;;  %p55_p4 = por %p54_p9, %p53_p8 }
  0x1e   : > { %s1426_s9 = scalar_select %p44_p12, %s1279_s23, %s46_s20  }
  0x1f   : > { %p1428_p5 = por %p173_p2, %p59_p10  ;;  %s255_s11 = sand.u32 1, %s1279_s23  }
  0x20   : > { %s912_s27 = sshll.u32 %s1287_s25, 2  ;;  %p994_p7 = scmp.lt.s32.totalorder %s1291_s26, 2 }
  0x21   : > { %s911_s12 = sshll.u32 %s255_s11, 2  ;;  %s1596_s0 = sld [smem:[#allocation15_spill]] }
  0x22   : > { %s259_s17 = scalar_lea.vmem [#allocation2], %s911_s12  ;;  %p982_p11 = pnand %p994_p7, %p55_p4 }
  0x23   : > { %s267_s29 = sshll.u32 %s259_s17, 4  ;;  %s256_s19 = scalar_lea.sflag [#allocation3], %s255_s11  ;;  %s268_s29 = int_to_ptr.vmem [resolvable:$true] %s267_s29 }
  0x24   : > { %s1441_s20 = sand.u32 (!%p1389_p3), 1, %s1275_s22  }
  0x25   : > { %276 = sbr.rel (%p1389_p3) target bundleno = 1124 (0x464), region = 40  ;;  %s914_s1 = sshll.u32 (!%p1389_p3), %s1441_s20, 2 }
  0x26   : > { %s279_s13 = scalar_lea.sflag (!%p1389_p3), [#allocation3], %s1441_s20 }
  0x27   : > { %s263_s15 = scalar_lea.hbm %s1596_s0, %s912_s27  ;;  %s282_s27 = scalar_lea.vmem (!%p1389_p3), [#allocation2], %s914_s1 }
  0x28   : > { %s265_s16 = sshll.u32 %s263_s15, 4  ;;  %s266_s16 = int_to_ptr.hbm [resolvable:$true] %s265_s16 }
  0x29   : > { %984 = dma.hbm_to_vmem [thread:$0]  (!%p982_p11), %s266_s16, 64, %s268_s29, %s256_s19  }
  0x2a   : > { %1254 = dma.done.wait (%p1417_p13), %s279_s13, 64  }
  0x2b   : > { %1256 = vsyncadd (%p1417_p13), %s279_s13, 4294967232 }
  0x2c   : > { %1258 = dma.done.wait (%p1381_p1), [#allocation6], 512  }
  0x2d   : > { %1260 = vsyncadd (%p1381_p1), [#allocation6], 4294966784  ;;  %v956_v0 = vld [vmem:[#allocation5 + $0x8] sm:$0xff]  ;;  %v955_v1 = vld [vmem:[#allocation5] sm:$0xff]  ;;  %vm354_vm0 = vcmask 261120   ;;  %s1297_s28 = smov 104  }
  0x2e   : > { %364 = vmatpush.bf16.msra.mxu0 %v956_v0  ;;  %v329_v2 = vld [vmem:[%s282_s27] sm:$0xf]  ;;  %s1298_s30 = smov 120   ;;  %s1299_s11 = smov 96   ;;  %vm377_vm1 = vcmask 64512   ;;  %vm428_vm2 = vcmask 1043456  }
  0x2f   : > { %v1065_v3 = vld [vmem:[%s1582_s2] ss:$0 sm:$0xff]  ;;  %s1300_s12 = smov 80   ;;  %s1301_s14 = smov 72  }
  0x30   : > { %s1302_s15 = smov 88   ;;  %s1303_s16 = smov 112  }
  0x31   : > { %s1304_s17 = smov 64   ;;  %s1305_s29 = smov 48  }
  0x32   : > { %365 = vmatpush.bf16.msra.mxu0 %v955_v1  ;;  %s1306_s19 = smov 56   ;;  %s1307_s13 = smov 40  }
  0x33   : > { %s918_s27 = sshll.u32 %s1441_s20, 5  ;;  %s1587_s8 = smov 8  }
  0x34   : > { %s1498_s1 = scalar_lea.vmem [#allocation9], %s918_s27 }
  0x35   : > { %927 = vmatmul.msk.bf16.vlgmr.msra.gmra.mxu0 %vm354_vm0, %v329_v2 }
  0xb2   : > { %v367_v4 = vpop.f32.mrf.mxu0 }
  0xb3   : > { %v368_v5 = vadd.f32 %v1065_v3, %v367_v4 }
  0xb5   : > { %v371_v6 = vpack.c.bf16 %v368_v5, %v368_v5 }
  0xb7   : > { %v373_v7 = vunpack.c.l.b16 %v371_v6 }
  0xb9   : > { %v1457_v8 = vpack.c.b16 %v373_v7, %v373_v7 }
  0xba   : > { %v369_v9 = vpop.f32.mrf.mxu0 }
  0xbb   : > { %587 = vrot.lane.b32.xlu2 %v1457_v8, %s1297_s28  ;;  %445 = vrot.lane.b32.xlu1 %v1457_v8, %s1298_s30  ;;  %s1309_s28 = smov 16   ;;  %s1310_s30 = smov 24  }
  0xbc   : > { %375 = vrot.lane.b32.xlu0 %v1457_v8, %s1299_s11  ;;  %s959_s11 = sshll.u32 %s1283_s24, 5 }
  0xc3   : > { %518 = vrot.lane.b32.xlu2 %v1457_v8, %s1300_s12  ;;  %589 = vrot.lane.b32.xlu1 %v1457_v8, %s1301_s14 }
  0xc4   : > { %447 = vrot.lane.b32.xlu0 %v1457_v8, %s1302_s15  ;;  %s760_s15 = scalar_lea.hbm %s1586_s6, %s959_s11 }
  0xcc   : > { %516 = vrot.lane.b32.xlu0 %v1457_v8, %s1303_s16  ;;  %s761_s16 = sshll.u32 %s1498_s1, 4  ;;  %s762_s16 = int_to_ptr.vmem [resolvable:$true] %s761_s16 }
 0x115   : > { %v588_v10 = vpop.permute.xlu2 %587 }
 0x11d   : > { %v519_v11 = vpop.permute.xlu2 %518 }
 0x11e   : > { %v524_v12 = vsel %vm377_vm1, %v519_v11, 0 }
 0x11f   : > { %533 = vmatpush.bf16.xpose.msrb.mxu0 %v524_v12 }
 0x12d   : > { %v446_v13 = vpop.permute.xlu1 %445 }
 0x12e   : > { %v376_v14 = vpop.permute.xlu0 %375 }
 0x12f   : > { %v382_v15 = vsel %vm377_vm1, %v376_v14, 0 }
 0x130   : > { %391 = vmatpush.bf16.xpose.msra.mxu1 %v382_v15 }
 0x135   : > { %v590_v16 = vpop.permute.xlu1 %589 }
 0x136   : > { %v448_v17 = vpop.permute.xlu0 %447  ;;  %v595_v18 = vsel %vm377_vm1, %v590_v16, 0 }
 0x137   : > { %928 = vmatmul.msk.bf16.vlgmr.msra.gmra.mxu1 %vm377_vm1, %v371_v6  ;;  %v453_v19 = vsel %vm377_vm1, %v448_v17, 0 }
 0x138   : > { %462 = vmatpush.bf16.xpose.msra.mxu3 %v453_v19 }
 0x13e   : > { %v517_v20 = vpop.permute.xlu0 %516 }
 0x13f   : > { %930 = vmatmul.msk.bf16.vlgmr.msra.gmra.mxu3 %vm377_vm1, %v446_v13  ;;  %933 = vmatmul.msk.bf16.vlgmr.msrb.gmra.mxu0 %vm377_vm1, %v517_v20 }
 0x140   : > { %604 = vmatpush.bf16.xpose.msrb.mxu3 %v595_v18 }
 0x14f   : > { %936 = vmatmul.msk.bf16.vlgmr.msrb.gmra.mxu3 %vm377_vm1, %v588_v10 }
 0x1b4   : > { %v393_v21 = vpop.f32.mrf.mxu1 }
 0x1b5   : > { %v397_v22 = vsel %vm377_vm1, %v393_v21, -inf }
 0x1b6   : > { %398 = vmax.xlane.f32.xlu1 %v397_v22 }
 0x1bc   : > { %v395_v23 = vpop.f32.mrf.mxu1  ;;  %v535_v24 = vpop.f32.mrf.mxu0 }
 0x1bd   : > { %v539_v29 = vsel %vm377_vm1, %v535_v24, -inf }
 0x1c2   : > { %v464_v25 = vpop.f32.mrf.mxu3 }
 0x1c3   : > { %v468_v26 = vsel %vm377_vm1, %v464_v25, -inf }
 0x1c4   : > { %469 = vmax.xlane.f32.xlu2 %v468_v26  ;;  %v537_v27 = vpop.f32.mrf.mxu0 }
 0x1ca   : > { %v466_v28 = vpop.f32.mrf.mxu3 }
 0x1cc   : > { %540 = vmax.xlane.f32.xlu2 %v539_v29 }
 0x1d2   : > { %v606_v30 = vpop.f32.mrf.mxu3 }
 0x1d3   : > { %v610_v31 = vsel %vm377_vm1, %v606_v30, -inf }
 0x1d4   : > { %611 = vmax.xlane.f32.xlu0 %v610_v31 }
 0x1da   : > { %v608_v32 = vpop.f32.mrf.mxu3 }
 0x1e8   : > { %423 = vrot.lane.b32.xlu0 %v1457_v8, %s1304_s17  ;;  %s763_s17 = sshll.u32 %s760_s15, 4  ;;  %s764_s17 = int_to_ptr.hbm [resolvable:$true] %s763_s17 }
 0x1f0   : > { %566 = vrot.lane.b32.xlu0 %v1457_v8, %s1305_s29  ;;  %s733_s29 = scalar_lea.sflag [#allocation10], %s1441_s20 }
 0x229   : > { %v399_v33 = vpop.xlane.xlu1 %398 }
 0x22a   : > { %v400_v34 = vsub.f32 %v393_v21, %v399_v33 }
 0x22c   : > { %v401_v35 = vmul.f32 1.442695, %v400_v34 }
 0x22e   : > { %1067 = vpow2.f32 %v401_v35 }
 0x234   : > { %v1068_v36 = vpop.eup %1067 }
 0x235   : > { %v403_v37 = vsel %vm377_vm1, %v1068_v36, 0.0 }
 0x236   : > { %404 = vadd.xlane.f32.xlu1 %v403_v37 }
 0x237   : > { %v470_v38 = vpop.xlane.xlu2 %469 }
 0x238   : > { %v471_v39 = vsub.f32 %v464_v25, %v470_v38 }
 0x23a   : > { %v472_v40 = vmul.f32 1.442695, %v471_v39 }
 0x23c   : > { %1069 = vpow2.f32 %v472_v40 }
 0x23f   : > { %v541_v41 = vpop.xlane.xlu2 %540 }
 0x240   : > { %v542_v42 = vsub.f32 %v535_v24, %v541_v41 }
 0x242   : > { %v1481_v43 = vpop.eup %1069  ;;  %v543_v44 = vmul.f32 1.442695, %v542_v42 }
 0x243   : > { %v474_v45 = vsel %vm377_vm1, %v1481_v43, 0.0 }
 0x244   : > { %1071 = vpow2.f32 %v543_v44  ;;  %475 = vadd.xlane.f32.xlu2 %v474_v45 }
 0x247   : > { %v612_v46 = vpop.xlane.xlu0 %611 }
 0x248   : > { %v613_v47 = vsub.f32 %v606_v30, %v612_v46 }
 0x24a   : > { %v1485_v48 = vpop.eup %1071  ;;  %v614_v49 = vmul.f32 1.442695, %v613_v47 }
 0x24b   : > { %v545_v50 = vsel %vm377_vm1, %v1485_v48, 0.0 }
 0x24c   : > { %1073 = vpow2.f32 %v614_v49  ;;  %546 = vadd.xlane.f32.xlu1 %v545_v50 }
 0x252   : > { %v1489_v51 = vpop.eup %1073 }
 0x253   : > { %v616_v52 = vsel %vm377_vm1, %v1489_v51, 0.0 }
 0x254   : > { %617 = vadd.xlane.f32.xlu1 %v616_v52 }
 0x25a   : > { %v424_v53 = vpop.permute.xlu0 %423 }
 0x25b   : > { %v430_v54 = vsel %vm428_vm2, %v424_v53, 0 }
 0x25c   : > { %495 = vrot.lane.b32.xlu2 %v1457_v8, %s1306_s19  ;;  %439 = vmatpush.bf16.msra.mxu2 %v430_v54  ;;  %s1187_s19 = sshra.s32 %s764_s17, 4  ;;  %s1188_s19 = int_to_ptr.hbm [resolvable:$true] %s1187_s19 }
 0x25d   : > { %p1194_p9 = scmp.lt.s32.totalorder %s1188_s19, %s1586_s6 }
 0x262   : > { %v567_v55 = vpop.permute.xlu0 %566 }
 0x263   : > { %v572_v56 = vsel %vm428_vm2, %v567_v55, 0 }
 0x264   : > { %581 = vmatpush.bf16.msrb.mxu1 %v572_v56 }
 0x26d   : > { %637 = vrot.lane.b32.xlu1 %v1457_v8, %s1307_s13  ;;  %s1189_s13 = scalar_lea.hbm %s1188_s19, 32 }
 0x26e   : > { %p1190_p1 = scmp.ne.s32.totalorder %s1188_s19, %s1189_s13 }
 0x270   : > { %p1191_p3 = pnand %p1190_p1, %p1421_p0 }
 0x272   : > { %p1192_p8 = pneg %p1191_p3 }
 0x2a9   : > { %v405_v57 = vpop.xlane.xlu1 %404 }
 0x2aa   : > { %1075 = vrcp.f32 %v405_v57  ;;  %v417_v61 = vand.u32 2147483648, %v405_v57  ;;  %v415_v63 = vand.u32 2147483647, %v405_v57  ;;  %vm411_vm4 = vweird.f32 %v405_v57 }
 0x2ac   : > { %v418_v2 = vor.u32 1.1754944e-38, %v417_v61  ;;  %vm416_vm6 = vcmp.eq.f32.partialorder %v415_v63, 8.507059e+37 }
 0x2b0   : > { %v1076_v58 = vpop.eup %1075 }
 0x2b1   : > { %v407_v59 = vmul.f32 %v1076_v58, %v405_v57  ;;  %vm412_vm3 = vweird.f32 %v1076_v58  ;;  %v958_v57 = vld [vmem:[#allocation7 + $0x8] sm:$0xff] }
 0x2b2   : > { %vm413_vm5 = vmor %vm411_vm4, %vm412_vm3  ;;  %703 = vmatpush.bf16.msra.mxu0 %v958_v57 }
 0x2b3   : > { %v408_v60 = vsub.f32 1.0, %v407_v59 }
 0x2b5   : > { %v409_v62 = vmul.f32 %v1076_v58, %v408_v60 }
 0x2b7   : > { %v410_v0 = vadd.f32 %v1076_v58, %v409_v62  ;;  %v476_v1 = vpop.xlane.xlu2 %475 }
 0x2b8   : > { %1077 = vrcp.f32 %v476_v1  ;;  %v488_v14 = vand.u32 2147483648, %v476_v1  ;;  %v486_v15 = vand.u32 2147483647, %v476_v1  ;;  %vm482_vm8 = vweird.f32 %v476_v1 }
 0x2b9   : > { %v414_v3 = vsel %vm413_vm5, %v1076_v58, %v410_v0  ;;  %v957_v58 = vld [vmem:[#allocation7] sm:$0xff] }
 0x2ba   : > { %v419_v4 = vsel %vm416_vm6, %v418_v2, %v414_v3  ;;  %v489_v19 = vor.u32 1.1754944e-38, %v488_v14  ;;  %vm487_vm10 = vcmp.eq.f32.partialorder %v486_v15, 8.507059e+37  ;;  %704 = vmatpush.bf16.msra.mxu0 %v957_v58  ;;  %vm673_vm6 = vcmask 195584  }
 0x2bb   : > { %v420_v5 = vmul.f32 %v1068_v36, %v419_v4 }
 0x2bd   : > { %421 = vst.msk [vmem:[%s1498_s1] sm:$0xff] %vm377_vm1, %v420_v5  ;;  %v422_v6 = vpack.c.bf16 %v420_v5, %v420_v5 }
 0x2be   : > { %v1078_v7 = vpop.eup %1077 }
 0x2bf   : > { %v478_v8 = vmul.f32 %v1078_v7, %v476_v1  ;;  %v547_v9 = vpop.xlane.xlu1 %546  ;;  %v496_v10 = vpop.permute.xlu2 %495  ;;  %929 = vmatmul.msk.bf16.vlgmr.msra.gmra.mxu2 %vm377_vm1, %v422_v6  ;;  %vm483_vm7 = vweird.f32 %v1078_v7 }
 0x2c0   : > { %1079 = vrcp.f32 %v547_v9  ;;  %v501_v12 = vsel %vm428_vm2, %v496_v10, 0  ;;  %vm484_vm9 = vmor %vm482_vm8, %vm483_vm7  ;;  %v559_v24 = vand.u32 2147483648, %v547_v9  ;;  %v557_v27 = vand.u32 2147483647, %v547_v9 }
 0x2c1   : > { %v479_v11 = vsub.f32 1.0, %v478_v8  ;;  %510 = vmatpush.bf16.msrb.mxu2 %v501_v12  ;;  %vm553_vm12 = vweird.f32 %v547_v9 }
 0x2c2   : > { %v560_v31 = vor.u32 1.1754944e-38, %v559_v24  ;;  %vm558_vm14 = vcmp.eq.f32.partialorder %v557_v27, 8.507059e+37 }
 0x2c3   : > { %v480_v13 = vmul.f32 %v1078_v7, %v479_v11 }
 0x2c5   : > { %v481_v16 = vadd.f32 %v1078_v7, %v480_v13 }
 0x2c6   : > { %v1080_v17 = vpop.eup %1079 }
 0x2c7   : > { %v485_v18 = vsel %vm484_vm9, %v1078_v7, %v481_v16  ;;  %v549_v20 = vmul.f32 %v1080_v17, %v547_v9  ;;  %v618_v21 = vpop.xlane.xlu1 %617  ;;  %vm554_vm11 = vweird.f32 %v1080_v17 }
 0x2c8   : > { %1081 = vrcp.f32 %v618_v21  ;;  %v490_v23 = vsel %vm487_vm10, %v489_v19, %v485_v18  ;;  %vm555_vm13 = vmor %vm553_vm12, %vm554_vm11  ;;  %v630_v37 = vand.u32 2147483648, %v618_v21  ;;  %v628_v39 = vand.u32 2147483647, %v618_v21 }
 0x2c9   : > { %v550_v22 = vsub.f32 1.0, %v549_v20  ;;  %v491_v25 = vmul.f32 %v1481_v43, %v490_v23  ;;  %vm624_vm3 = vweird.f32 %v618_v21 }
 0x2ca   : > { %v631_v42 = vor.u32 1.1754944e-38, %v630_v37  ;;  %vm629_vm5 = vcmp.eq.f32.partialorder %v628_v39, 8.507059e+37 }
 0x2cb   : > { %v551_v26 = vmul.f32 %v1080_v17, %v550_v22  ;;  %931 = vst.msk [vmem:[%s1498_s1 + $0x8] sm:$0xff] %vm377_vm1, %v491_v25  ;;  %v494_v29 = vpack.c.bf16 %v491_v25, %v491_v25 }
 0x2cd   : > { %v552_v28 = vadd.f32 %v1080_v17, %v551_v26 }
 0x2ce   : > { %v1082_v30 = vpop.eup %1081 }
 0x2cf   : > { %v556_v32 = vsel %vm555_vm13, %v1080_v17, %v552_v28  ;;  %v620_v33 = vmul.f32 %v1082_v30, %v618_v21  ;;  %932 = vmatmul.msk.bf16.vlgmr.msrb.gmra.mxu2 %vm377_vm1, %v494_v29  ;;  %vm625_vm15 = vweird.f32 %v1082_v30 }
 0x2d0   : > { %v561_v34 = vsel %vm558_vm14, %v560_v31, %v556_v32  ;;  %vm626_vm4 = vmor %vm624_vm3, %vm625_vm15 }
 0x2d1   : > { %v621_v35 = vsub.f32 1.0, %v620_v33  ;;  %v562_v36 = vmul.f32 %v1485_v48, %v561_v34 }
 0x2d3   : > { %v622_v38 = vmul.f32 %v1082_v30, %v621_v35  ;;  %934 = vst.msk [vmem:[%s1498_s1 + $0x10] sm:$0xff] %vm377_vm1, %v562_v36  ;;  %v565_v40 = vpack.c.bf16 %v562_v36, %v562_v36 }
 0x2d5   : > { %v623_v41 = vadd.f32 %v1082_v30, %v622_v38  ;;  %935 = vmatmul.msk.bf16.vlgmr.msrb.gmra.mxu1 %vm377_vm1, %v565_v40 }
 0x2d7   : > { %v627_v43 = vsel %vm626_vm4, %v1082_v30, %v623_v41 }
 0x2d8   : > { %v632_v44 = vsel %vm629_vm5, %v631_v42, %v627_v43 }
 0x2d9   : > { %v633_v45 = vmul.f32 %v1489_v51, %v632_v44 }
 0x2db   : > { %937 = vst.msk [vmem:[%s1498_s1 + $0x18] sm:$0xff] %vm377_vm1, %v633_v45  ;;  %v636_v48 = vpack.c.bf16 %v633_v45, %v633_v45 }
 0x2df   : > { %v638_v46 = vpop.permute.xlu1 %637 }
 0x2e0   : > { %v643_v47 = vsel %vm428_vm2, %v638_v46, 0  ;;  %vm671_vm2 = vcmask 130048  }
 0x2e1   : > { %652 = vmatpush.bf16.msra.mxu2 %v643_v47 }
 0x2e4   : > { %938 = vmatmul.msk.bf16.vlgmr.msra.gmra.mxu2 %vm377_vm1, %v636_v48 }
 0x342   : > { %v441_v49 = vpop.f32.mrf.mxu2 }
 0x34a   : > { %v443_v50 = vpop.f32.mrf.mxu2 }
 0x352   : > { %v512_v52 = vpop.f32.mrf.mxu2  ;;  %v583_v53 = vpop.f32.mrf.mxu1 }
 0x353   : > { %659 = vrot.lane.b32.xlu0 %v512_v52, %s1587_s8  ;;  %663 = vrot.lane.b32.xlu2 %v583_v53, %s1309_s28 }
 0x35a   : > { %v514_v54 = vpop.f32.mrf.mxu2  ;;  %v585_v51 = vpop.f32.mrf.mxu1 }
 0x367   : > { %v654_v55 = vpop.f32.mrf.mxu2 }
 0x368   : > { %667 = vrot.lane.b32.xlu0 %v654_v55, %s1310_s30  ;;  %s1193_s30 = scalar_lea.hbm %s1586_s6, 64 }
 0x369   : > { %p1195_p10 = scmp.lt.s32.totalorder %s1193_s30, %s1189_s13 }
 0x36b   : > { %p1196_p12 = por %p1195_p10, %p1194_p9 }
 0x36d   : > { %p1197_p13 = pnand %p1196_p12, %p1192_p8 }
 0x36f   : > { %v656_v56 = vpop.f32.mrf.mxu2 }
 0x3ad   : > { %v664_v61 = vpop.permute.xlu2 %663 }
 0x3c5   : > { %v660_v59 = vpop.permute.xlu0 %659 }
 0x3c6   : > { %v670_v60 = vsel %vm377_vm1, %v441_v49, %v660_v59 }
 0x3c7   : > { %v672_v62 = vsel %vm671_vm2, %v670_v60, %v664_v61 }
 0x3da   : > { %v668_v63 = vpop.permute.xlu0 %667 }
 0x3db   : > { %v674_v0 = vsel %vm673_vm6, %v672_v62, %v668_v63 }
 0x3dc   : > { %v675_v1 = vpack.c.bf16 %v674_v0, %v674_v0 }
 0x3de   : > { %947 = vmatmul.msk.bf16.vlgmr.msra.gmra.mxu0 %vm354_vm0, %v675_v1 }
 0x3df   : > { %1200 = shalt.err (!%p1197_p13)
}
 0x3e0   : > { %s1311_s1 = smov 128   ;;  %s1597_s11 = smov 8   ;;  %v1066_v2 = vld [vmem:[%s1584_s4] ss:$0 sm:$0xff] }
 0x3e1   : > { %971 = dma.vmem_to_hbm [thread:$0]  (%p1421_p0), %s762_s16, 512, %s764_s17, %s733_s29, %s1311_s1, %s1311_s1, %s1597_s11  }
 0x3e2   : > { %s950_s12 = sshll.u32 %s1283_s24, 3  ;;  %s917_s14 = sshll.u32 %s1441_s20, 3 }
 0x3e3   : > { %s743_s0 = scalar_lea.hbm %s1585_s5, %s950_s12  ;;  %s319_s13 = scalar_lea.vmem [#allocation8], %s917_s14 }
 0x3e4   : > { %s745_s28 = sshll.u32 %s319_s13, 4  ;;  %s747_s30 = sshll.u32 %s743_s0, 4  ;;  %s746_s28 = int_to_ptr.vmem [resolvable:$true] %s745_s28  ;;  %s748_s30 = int_to_ptr.hbm [resolvable:$true] %s747_s30 }
 0x3e5   : > { %s728_s24 = scalar_lea.sflag [#allocation4], %s1441_s20  ;;  %s1215_s16 = sshra.s32 %s748_s30, 4  ;;  %s1216_s16 = int_to_ptr.hbm [resolvable:$true] %s1215_s16 }
 0x3e6   : > { %s1217_s17 = scalar_lea.hbm %s1216_s16, 8  ;;  %s1221_s11 = scalar_lea.hbm %s1585_s5, 16 }
 0x3e7   : > { %p1218_p2 = scmp.ne.s32.totalorder %s1216_s16, %s1217_s17  ;;  %p1222_p11 = scmp.lt.s32.totalorder %s1216_s16, %s1585_s5 }
 0x3e8   : > { %p1223_p1 = scmp.lt.s32.totalorder %s1221_s11, %s1217_s17 }
 0x3e9   : > { %p1219_p4 = pnand %p1218_p2, %p1421_p0 }
 0x3ea   : > { %p1224_p3 = por %p1223_p1, %p1222_p11 }
 0x3eb   : > { %p1220_p7 = pneg %p1219_p4 }
 0x3ed   : > { %p1225_p8 = pnand %p1224_p3, %p1220_p7 }
 0x45b   : > { %v706_v3 = vpop.f32.mrf.mxu0 }
 0x45c   : > { %v718_v4 = vadd.f32 %v1066_v2, %v706_v3 }
 0x45e   : > { %719 = vst.msk [vmem:[%s319_s13] sm:$0xff] %vm354_vm0, %v718_v4 }
 0x45f   : > { %1228 = shalt.err (!%p1225_p8)
}
 0x460   : > { %970 = dma.vmem_to_hbm [thread:$0]  (%p1421_p0), %s746_s28, 128, %s748_s30, %s728_s24  }
 0x463   : > { %v708_v5 = vpop.f32.mrf.mxu0 }
 0x464 PF: > { %s778_s20 = sand.u32 1, %s1271_s21   ;;  %p986_p9 = pnand %p910_p6, %p1428_p5 }
 0x465   : > { %s779_s15 = scalar_lea.sflag [#allocation4], %s778_s20 }
 0x466   : > { %p987_p10 = pneg %p986_p9 }
 0x468   : > { %1262 = dma.done.wait (%p987_p10), %s779_s15, 128  }
 0x469   : > { %1264 = vsyncadd (%p987_p10), %s779_s15, 4294967168  ;;  %s789_s27 = scalar_lea.sflag [#allocation10], %s778_s20 }
 0x46a   : > { %1266 = dma.done.wait (%p987_p10), %s789_s27, 512  }
 0x46b   : > { %1268 = vsyncadd (%p987_p10), %s789_s27, 4294966784  ;;  %s27_s26 = sadd.s32 1, %s1291_s26   ;;  %s1598_s21 = smov %s1275_s22 }
 0x46c   : > { %p24_p12 = scmp.ge.s32.totalorder %s27_s26, 4   ;;  %s1599_s22 = smov %s1279_s23 }
 0x46d   : > { %s1600_s23 = smov %s1426_s9  ;;  %s1601_s24 = smov %s1287_s25 }
 0x46e   : > { %s1602_s25 = smov %s1604_s18  ;;  %26 = sbr.rel (!%p24_p12) target bundleno = 12 (0xc), region = 124 }
 0x473   :  { %795 = vsyncpa [#allocation3], 1 }
 0x474   :  { %797 = vsyncpa [#allocation3 + $0x1], 1 }
 0x475   :  { %798 = vsyncpa [#allocation6], 1 }
 0x476   :  { %799 = vsyncpa [#allocation4], 1 }
 0x477   :  { %801 = vsyncpa [#allocation4 + $0x1], 1 }
 0x478   :  { %802 = vsyncpa [#allocation10], 1 }
 0x479   :  { %804 = vsyncpa [#allocation10 + $0x1], 1 }

</bundles_post_ra>
